<compile_context>
chip_gen: v6e
topology: v6e:2x2x1
jax: 0.10.0
libtpu: 0.0.40
codegen_flags: <defaults>
</compile_context>

<pallas_src>
import numpy as np
import jax
import jax.numpy as jnp
from jax import lax
from jax.experimental import pallas as pl
from jax.experimental.pallas import tpu as pltpu

# ----------------------------- configuration (small) -----------------------------
PATCH = 2
OLD_IN = 4             # old_in_channels
COND_IN = 4            # cond_in_channels
EMBED = 32             # embed_dim (divisible by 16)
AUDIO_DIM = 8          # audio_embed_dim
TCR = 4                # temporal_compression_ratio
SAMPLE_H = 16
SAMPLE_W = 16
SAMPLE_F = 13
MAX_REFS = 4
SP_SCALE = 1.875
TP_SCALE = 1.0

PACK = 4                                            # tokens packed per output row
K_TOK = (OLD_IN + COND_IN) * PATCH * PATCH          # 32 fused input features per token
ROW_IN = PACK * K_TOK                               # 128-lane packed input row
ROW_OUT = PACK * EMBED                              # 128-lane packed output row
MAX_TILE_ROWS = 1024                                # keeps per-step VMEM small everywhere
assert ROW_IN % 128 == 0 and ROW_OUT % 128 == 0

# ----------------------------- sincos positional embeddings (numpy, buffer init) --
def _sincos_1d(embed_dim, pos):
    omega = np.arange(embed_dim // 2, dtype=np.float64)
    omega /= embed_dim / 2.0
    omega = 1.0 / 10000 ** omega
    pos = pos.reshape(-1)
    out = np.einsum('m,d->md', pos, omega)
    return np.concatenate([np.sin(out), np.cos(out)], axis=1)


def _sincos_2d(embed_dim, grid):
    emb_h = _sincos_1d(embed_dim // 2, grid[0])
    emb_w = _sincos_1d(embed_dim // 2, grid[1])
    return np.concatenate([emb_h, emb_w], axis=1)


def _sincos_3d(embed_dim, spatial_size, temporal_size, sp_scale, tp_scale, use_temporal):
    embed_dim_spatial = 3 * embed_dim // 4
    embed_dim_temporal = embed_dim // 4
    grid_h = np.arange(spatial_size[1], dtype=np.float32) / sp_scale
    grid_w = np.arange(spatial_size[0], dtype=np.float32) / sp_scale
    grid = np.meshgrid(grid_w, grid_h)  # 'xy' indexing, same as torch
    grid = np.stack(grid, axis=0).reshape([2, 1, spatial_size[1], spatial_size[0]])
    pos_spatial = _sincos_2d(embed_dim_spatial, grid)                      # [H*W, 3D/4]
    pos_spatial = np.repeat(pos_spatial[None], temporal_size, axis=0)      # [T, H*W, 3D/4]
    if use_temporal:
        grid_t = np.arange(temporal_size, dtype=np.float32) / tp_scale
        pos_temporal = _sincos_1d(embed_dim_temporal, grid_t)              # [T, D/4]
        pos_temporal = np.repeat(pos_temporal[:, None],
                                 spatial_size[0] * spatial_size[1], axis=1)
        return np.concatenate([pos_temporal, pos_spatial], axis=-1)        # [T, H*W, D]
    return pos_spatial                                                     # [T, H*W, 3D/4]


def build_buffers():
    post_h = SAMPLE_H // PATCH
    post_w = SAMPLE_W // PATCH
    post_t = (SAMPLE_F - 1) // TCR + 1
    pos = _sincos_3d(EMBED, (post_w, post_h), post_t, SP_SCALE, TP_SCALE, True)
    pos = pos.reshape(post_t, post_h, post_w, EMBED)
    ref_sp = _sincos_3d(EMBED, (post_w, post_h), 1, SP_SCALE, TP_SCALE, False)
    ref_sp = ref_sp.reshape(1, post_h, post_w, 3 * EMBED // 4)
    ref_t = np.stack([np.array([(i >> 1) & 1, i & 1], dtype=np.float32)
                      for i in range(MAX_REFS)], axis=0)                   # [4, 2]
    return {
        'pos_embedding': jnp.asarray(pos, jnp.float32),
        'ref_spatial': jnp.asarray(ref_sp, jnp.float32),
        'ref_temporal': jnp.asarray(ref_t, jnp.float32),
    }


# ----------------------------- Pallas kernel ---------------------------------------
def _make_cap_kernel(frames_per_tile, rows_per_frame, out_width):
    tile_rows = frames_per_tile * rows_per_frame

    def kernel(x_ref, w_ref, add_ref, aud_ref, o_ref):
        # x_ref  : [tile_rows, ROW_IN]   lane-packed tokens (PACK tokens per row)
        # w_ref  : [ROW_IN, ROW_OUT]     block-diagonal fused (proj | cond) weight
        # add_ref: [tile_rows, ROW_OUT]  lane-packed (pos + bias), batch independent
        # aud_ref: [frames_per_tile, ROW_OUT]   per-frame audio rows for this tile
        acc = jnp.dot(x_ref[...], w_ref[...], preferred_element_type=jnp.float32)
        acc = acc + add_ref[...]
        # rows_per_frame is a multiple of 8 -> the sublane split is layout-preserving;
        # the frame-wise audio add is a plain VPU broadcast-add (no VMEM temp slab).
        acc = acc.reshape(frames_per_tile, rows_per_frame, out_width)
        acc = acc + aud_ref[...][:, None, :]
        o_ref[...] = acc.reshape(tile_rows, out_width).astype(o_ref.dtype)

    return kernel


def _pick_frames_per_tile(f_total, rows_per_frame, batch, max_rows=MAX_TILE_ROWS):
    """Largest divisor of f_total whose tile fits max_rows; keep >=2 grid steps."""
    divisors = [d for d in range(1, f_total + 1) if f_total % d == 0]
    fitting = [d for d in divisors if d * rows_per_frame <= max_rows] or [1]
    fpt = max(fitting)
    if batch * (f_total // fpt) < 2:            # feed both v7x TensorCores if possible
        smaller = [d for d in fitting if d < fpt]
        if smaller:
            fpt = max(smaller)
    return fpt
    # TODO(synk): sub-frame row tiling for rows_per_frame > MAX_TILE_ROWS (huge frames).


def fused_cap_embed(xp, w_bd, addp, aud_tiled, frames_per_tile, rows_per_frame):
    """xp:[B,R,WX]  w_bd:[WX,WO]  addp:[R,WO]  aud_tiled:[B,n_tiles,FPT,WO] -> [B,R,WO].

    grid = (batch, row_tiles); the weight has a constant index_map (DMA'd once),
    the (pos+bias) table is batch-shared, audio rows are delivered per tile.
    """
    B, R, WX = xp.shape
    WO = w_bd.shape[1]
    n_tiles = aud_tiled.shape[1]
    tile_rows = frames_per_tile * rows_per_frame
    assert R == n_tiles * tile_rows
    assert rows_per_frame % 8 == 0 and WX % 128 == 0 and WO % 128 == 0

    kernel = _make_cap_kernel(frames_per_tile, rows_per_frame, WO)
    cost = pl.CostEstimate(
        flops=2 * B * R * WX * WO,
        transcendentals=0,
        bytes_accessed=4 * (B * R * WX + WX * WO + R * WO
                            + B * n_tiles * frames_per_tile * WO + B * R * WO),
    )
    return pl.pallas_call(
        kernel,
        out_shape=jax.ShapeDtypeStruct((B, R, WO), jnp.float32),
        grid_spec=pltpu.PrefetchScalarGridSpec(
            num_scalar_prefetch=0,
            grid=(B, n_tiles),
            in_specs=[
                pl.BlockSpec((None, tile_rows, WX), lambda b, t: (b, t, 0)),
                pl.BlockSpec((WX, WO), lambda b, t: (0, 0)),
                pl.BlockSpec((tile_rows, WO), lambda b, t: (t, 0)),
                pl.BlockSpec((None, None, frames_per_tile, WO), lambda b, t: (b, t, 0, 0)),
            ],
            out_specs=pl.BlockSpec((None, tile_rows, WO), lambda b, t: (b, t, 0)),
        ),
        compiler_params=pltpu.CompilerParams(
            dimension_semantics=("parallel", "parallel")),
        cost_estimate=cost,
    )(xp, w_bd, addp, aud_tiled)


# ----------------------------- glue ------------------------------------------------
def patchify_pack(x, p, pack):
    """[B, F, C, H, W] -> [B, F*(H/p)*(W/p)//pack, pack*C*p*p].

    Single transpose (one relayout) + free row-major reshapes; per-token column
    order is (c, kh, kw), so channel-concatenated inputs yield [xi || xc] rows.
    """
    B, F, C, H, W = x.shape
    hp, wp = H // p, W // p
    x = x.reshape(B, F, C, hp, p, wp, p)
    x = x.transpose(0, 1, 3, 5, 2, 4, 6)                  # B, F, hp, wp, C, ph, pw
    return x.reshape(B, (F * hp * wp) // pack, pack * C * p * p)


def precompute(params):
    """Per-parameter constants, hoisted out of the per-forward path."""
    w_fused = jnp.concatenate([params['W_img'], params['W_cond']], axis=0)   # [K_TOK, D]
    w_bd = jnp.kron(jnp.eye(PACK, dtype=jnp.float32), w_fused)               # [ROW_IN, ROW_OUT]
    bias = params['b_img'] + params['b_cond']
    return {'w_bd': w_bd, 'bias': bias}


def bilinear_interp_time(audio, n_frames):
    """Matches F.interpolate(audio.permute(0,2,1)[...,None], (n_frames,1),
    mode='bilinear', align_corners=False) along the time axis."""
    B, T_in, C = audio.shape
    scale = T_in / n_frames
    dst = jnp.arange(n_frames, dtype=jnp.float32)
    src = (dst + 0.5) * scale - 0.5
    src = jnp.maximum(src, 0.0)
    i0 = jnp.clip(jnp.floor(src).astype(jnp.int32), 0, T_in - 1)
    i1 = jnp.minimum(i0 + 1, T_in - 1)
    lam = (src - i0.astype(jnp.float32))[None, :, None]
    return audio[:, i0, :] * (1.0 - lam) + audio[:, i1, :] * lam


def _audio_and_reft(params, bufs, audio_embeds, n_latents):
    # Tiny projections stay in plain jnp: a few hundred FLOPs each; a dedicated
    # pallas_call costs more in launch overhead + masked 2/32-lane I/O than it saves.
    B = audio_embeds.shape[0]
    n_frames = (n_latents - 1) * TCR + 1
    a = bilinear_interp_time(audio_embeds, n_frames)                 # [B, n_frames, C]
    a = jnp.pad(a, ((0, 0), (TCR - 1, 0), (0, 0)))                   # left-pad time
    a = a.reshape(B, n_latents, TCR * AUDIO_DIM)
    audio_tok = a @ params['W_audio'] + params['b_audio'][None, None, :]      # [B,T,D]
    ref_temp = bufs['ref_temporal'] @ params['W_reft'] + params['b_reft'][None, :]
    return audio_tok, ref_temp                                        # [4, D/4]


def forward_pallas(params, consts, bufs, audio_embeds, text_embeds, image_embeds,
                   image_conds, sequence_infos):
    pos_embedding = bufs['pos_embedding']
    ref_sp = bufs['ref_spatial'][0]                                   # [Hp, Wp, 3D/4]
    B = audio_embeds.shape[0]
    n_latents = len(sequence_infos[-1][1])
    audio_tok, ref_temp = _audio_and_reft(params, bufs, audio_embeds, n_latents)

    # TODO(synk): training-mode random seq/subsample offsets (torch.randint) are
    # eval-time no-ops here (patch_h == pos_h, not training), so they are omitted.

    x_segs, pos_segs, aud_segs = [], [], []
    rows_per_frame = None
    ref_id = 0
    for img_embed, img_cond, seq_info in zip(image_embeds, image_conds, sequence_infos):
        b, f, c, h, w = img_embed.shape
        hp, wp = h // PATCH, w // PATCH
        assert (hp * wp) % (8 * PACK) == 0
        if rows_per_frame is None:
            rows_per_frame = (hp * wp) // PACK
        assert rows_per_frame == (hp * wp) // PACK                    # uniform frame size
        # channel-concat BEFORE patchify: (c,kh,kw) column order => exactly [xi || xc]
        x = jnp.concatenate([img_embed, img_cond], axis=2)            # [b, f, 8, h, w]
        x_segs.append(patchify_pack(x, PATCH, PACK))                  # [b, f*hp*wp/PACK, 128]
        if seq_info[0]:
            pos = jnp.concatenate(
                [jnp.broadcast_to(ref_temp[ref_id], (hp, wp, EMBED // 4)), ref_sp], axis=-1)
            pos = jnp.broadcast_to(pos[None], (f, hp, wp, EMBED))
            aud = jnp.zeros((B, f, EMBED), jnp.float32)               # no audio on refs
            ref_id += 1
        else:
            idx = jnp.asarray(seq_info[1])
            pos = pos_embedding[idx]                                  # [f, Hp, Wp, D]
            aud = audio_tok[:, :f]                                    # f == n_latents
        pos_segs.append(pos.reshape(f * hp * wp, EMBED))
        aud_segs.append(aud)

    Xp = jnp.concatenate(x_segs, axis=1)                              # [B, R, ROW_IN]
    POS = jnp.concatenate(pos_segs, axis=0) + consts['bias'][None, :] # [M, D] (batch shared)
    AUD = jnp.concatenate(aud_segs, axis=1)                           # [B, F_total, D]
    R = Xp.shape[1]
    F_total = AUD.shape[1]

    ADDp = POS.reshape(R, ROW_OUT)                                    # lane-pack pos+bias
    AUDp = jnp.tile(AUD, (1, 1, PACK))                                # [B, F_total, ROW_OUT]
    fpt = _pick_frames_per_tile(F_total, rows_per_frame, B)
    AUDt = AUDp.reshape(B, F_total // fpt, fpt, ROW_OUT)              # per-tile audio rows

    out = fused_cap_embed(Xp, consts['w_bd'], ADDp, AUDt, fpt, rows_per_frame)
    out = out.reshape(B, R * PACK, EMBED)                             # unpack to [B, M, D]
    return jnp.concatenate([text_embeds, out], axis=1)


# ----------------------------- pure-JAX reference (for correctness check) ----------
def _conv2d_ref(x, w_flat, b, p):
    # w_flat: [C*p*p, D] with column order (c,kh,kw) -> OIHW
    C = x.shape[1]
    D = w_flat.shape[1]
    w_oihw = w_flat.reshape(C, p, p, D).transpose(3, 0, 1, 2)
    y = lax.conv_general_dilated(x, w_oihw, (p, p), 'VALID',
                                 dimension_numbers=('NCHW', 'OIHW', 'NCHW'))
    return y + b[None, :, None, None]


def forward_reference(params, bufs, audio_embeds, text_embeds, image_embeds, image_conds,
                      sequence_infos):
    pos_embedding = bufs['pos_embedding']
    B = audio_embeds.shape[0]
    n_latents = len(sequence_infos[-1][1])
    audio_tok, ref_temp = _audio_and_reft(params, bufs, audio_embeds, n_latents)
    ref_sp = bufs['ref_spatial']                                      # [1, Hp, Wp, 3D/4]
    Hp, Wp = ref_sp.shape[1], ref_sp.shape[2]
    ref_temp_full = jnp.broadcast_to(ref_temp[None, :, None, None, :],
                                     (B, MAX_REFS, Hp, Wp, EMBED // 4))
    ref_sp_full = jnp.broadcast_to(ref_sp[None], (B, MAX_REFS, Hp, Wp, ref_sp.shape[-1]))
    ref_embed = jnp.concatenate([ref_temp_full, ref_sp_full], axis=-1)

    out_embeds = []
    ref_id = 0
    for img_embed, img_cond, seq_info in zip(image_embeds, image_conds, sequence_infos):
        b, f, c, h, w = img_embed.shape
        hp, wp = h // PATCH, w // PATCH
        y = _conv2d_ref(img_embed.reshape(-1, c, h, w), params['W_img'], params['b_img'], PATCH)
        yc = _conv2d_ref(img_cond.reshape(-1, img_cond.shape[2], h, w),
                         params['W_cond'], params['b_cond'], PATCH)
        y = (y + yc).reshape(b, f, EMBED, hp, wp)
        if not seq_info[0]:
            y = y + audio_tok[:, :, :, None, None]
        y = y.reshape(b, f, EMBED, hp * wp).transpose(0, 1, 3, 2).reshape(b, f * hp * wp, EMBED)
        if seq_info[0]:
            pos = ref_embed[:, ref_id:ref_id + 1]
            ref_id += 1
        else:
            idx = jnp.asarray(seq_info[1])
            pos = jnp.broadcast_to(pos_embedding[idx][None], (b, f, hp, wp, EMBED))
        pos = jnp.broadcast_to(pos, (b, f, hp, wp, EMBED)).reshape(b, f * hp * wp, EMBED)
        out_embeds.append(y + pos)
    return jnp.concatenate([text_embeds] + out_embeds, axis=1)


# ----------------------------- main -------------------------------------------------
if __name__ == "__main__":
    key = jax.random.PRNGKey(0)
    ks = jax.random.split(key, 12)
    params = {
        'W_img': jax.random.normal(ks[0], (OLD_IN * PATCH * PATCH, EMBED), jnp.float32) * 0.02,
        'b_img': jax.random.normal(ks[1], (EMBED,), jnp.float32) * 0.02,
        # cond_proj is zero_module()'d in the PyTorch __init__
        'W_cond': jnp.zeros((COND_IN * PATCH * PATCH, EMBED), jnp.float32),
        'b_cond': jnp.zeros((EMBED,), jnp.float32),
        'W_audio': jax.random.normal(ks[2], (TCR * AUDIO_DIM, EMBED), jnp.float32) * 0.02,
        'b_audio': jax.random.normal(ks[3], (EMBED,), jnp.float32) * 0.02,
        'W_reft': jax.random.normal(ks[4], (2, EMBED // 4), jnp.float32) * 0.02,
        'b_reft': jax.random.normal(ks[5], (EMBED // 4,), jnp.float32) * 0.02,
    }
    bufs = build_buffers()
    consts = precompute(params)          # hoisted: only changes with params

    B = 2
    audio = jax.random.normal(ks[6], (B, 16, AUDIO_DIM), jnp.float32)
    text = jax.random.normal(ks[7], (B, 6, EMBED), jnp.float32)
    img_ref = jax.random.normal(ks[8], (B, 1, OLD_IN, SAMPLE_H, SAMPLE_W), jnp.float32)
    img_vid = jax.random.normal(ks[9], (B, 3, OLD_IN, SAMPLE_H, SAMPLE_W), jnp.float32)
    cond_ref = jax.random.normal(ks[10], (B, 1, COND_IN, SAMPLE_H, SAMPLE_W), jnp.float32)
    cond_vid = jax.random.normal(ks[11], (B, 3, COND_IN, SAMPLE_H, SAMPLE_W), jnp.float32)
    # (is_reference_segment, latent frame indices)
    sequence_infos = [(True, np.array([0])), (False, np.array([0, 1, 2]))]

    out = forward_pallas(params, consts, bufs, audio, text,
                         [img_ref, img_vid], [cond_ref, cond_vid], sequence_infos)
    out = jax.block_until_ready(out)

    ref = forward_reference(params, bufs, audio, text,
                            [img_ref, img_vid], [cond_ref, cond_vid], sequence_infos)
    ref = jax.block_until_ready(ref)

    assert out.shape == (B, 6 + 1 * 8 * 8 + 3 * 8 * 8, EMBED), out.shape
    np.testing.assert_allclose(np.asarray(out), np.asarray(ref), rtol=2e-4, atol=2e-4)
    print("KERNEL_OK")
</pallas_src>

<mosaic_0001>
module attributes {stable_mosaic.version = 11 : i64} {
  func.func @kernel(%arg0: i32, %arg1: i32, %arg2: memref<1x64x128xf32, #tpu.memory_space<vmem>>, %arg3: memref<128x128xf32, #tpu.memory_space<vmem>>, %arg4: memref<64x128xf32, #tpu.memory_space<vmem>>, %arg5: memref<1x1x4x128xf32, #tpu.memory_space<vmem>>, %arg6: memref<1x64x128xf32, #tpu.memory_space<vmem>>) attributes {dimension_semantics = [#tpu.dimension_semantics<parallel>, #tpu.dimension_semantics<parallel>], iteration_bounds = array<i64: 2, 1>, scalar_prefetch = 0 : i64, scratch_operands = 0 : i64, tpu.core_type = #tpu.core_type<tc>, window_params = [{transform_indices = @transform_0, window_bounds = array<i64: 1, 64, 128>}, {pipeline_mode = #tpu.pipeline_mode<synchronous>, transform_indices = @transform_1, window_bounds = array<i64: 128, 128>}, {transform_indices = @transform_2, window_bounds = array<i64: 64, 128>}, {transform_indices = @transform_3, window_bounds = array<i64: 1, 1, 4, 128>}, {transform_indices = @transform_4, window_bounds = array<i64: 1, 64, 128>}]} {
    %c0 = arith.constant 0 : index
    %c0_0 = arith.constant 0 : index
    %c0_1 = arith.constant 0 : index
    %0 = vector.load %arg2[%c0, %c0_0, %c0_1] : memref<1x64x128xf32, #tpu.memory_space<vmem>>, vector<1x64x128xf32>
    %1 = vector.shape_cast %0 : vector<1x64x128xf32> to vector<64x128xf32>
    %c0_2 = arith.constant 0 : index
    %c0_3 = arith.constant 0 : index
    %2 = vector.load %arg3[%c0_2, %c0_3] : memref<128x128xf32, #tpu.memory_space<vmem>>, vector<128x128xf32>
    %cst = arith.constant dense<0.000000e+00> : vector<64x128xf32>
    %3 = tpu.matmul %1, %2, %cst {dimension_numbers = #tpu.dot_dimension_numbers<[1], [0], [0], [1], [0, 0, 1, 1], [], []>} : vector<64x128xf32>, vector<128x128xf32>, vector<64x128xf32> -> vector<64x128xf32>
    %c0_4 = arith.constant 0 : index
    %c0_5 = arith.constant 0 : index
    %4 = vector.load %arg4[%c0_4, %c0_5] : memref<64x128xf32, #tpu.memory_space<vmem>>, vector<64x128xf32>
    %5 = arith.addf %3, %4 : vector<64x128xf32>
    %6 = vector.shape_cast %5 : vector<64x128xf32> to vector<4x16x128xf32>
    %c0_6 = arith.constant 0 : index
    %c0_7 = arith.constant 0 : index
    %c0_8 = arith.constant 0 : index
    %c0_9 = arith.constant 0 : index
    %7 = vector.load %arg5[%c0_6, %c0_7, %c0_8, %c0_9] : memref<1x1x4x128xf32, #tpu.memory_space<vmem>>, vector<1x1x4x128xf32>
    %8 = vector.shape_cast %7 : vector<1x1x4x128xf32> to vector<4x128xf32>
    %9 = vector.shape_cast %8 : vector<4x128xf32> to vector<4x1x128xf32>
    %10 = vector.broadcast %9 : vector<4x1x128xf32> to vector<4x16x128xf32>
    %11 = arith.addf %6, %10 : vector<4x16x128xf32>
    %12 = vector.shape_cast %11 : vector<4x16x128xf32> to vector<64x128xf32>
    %c0_10 = arith.constant 0 : index
    %c0_11 = arith.constant 0 : index
    %c0_12 = arith.constant 0 : index
    %13 = vector.load %arg6[%c0_10, %c0_11, %c0_12] : memref<1x64x128xf32, #tpu.memory_space<vmem>>, vector<1x64x128xf32>
    %14 = vector.shape_cast %13 : vector<1x64x128xf32> to vector<64x128xf32>
    %15 = vector.shape_cast %12 : vector<64x128xf32> to vector<1x64x128xf32>
    tpu.vector_store %arg6[%c0_10, %c0_11, %c0_12], %15 {strides = array<i32>} : memref<1x64x128xf32, #tpu.memory_space<vmem>>, vector<1x64x128xf32>,
    return
  }
  func.func @transform_0(%arg0: i32, %arg1: i32) -> (i32, i32, i32) {
    %c0_i32 = arith.constant 0 : i32
    %c0_i32_0 = arith.constant 0 : i32
    return %arg0, %arg1, %c0_i32 : i32, i32, i32
  }
  func.func @transform_1(%arg0: i32, %arg1: i32) -> (i32, i32) {
    %c0_i32 = arith.constant 0 : i32
    %c0_i32_0 = arith.constant 0 : i32
    %c0_i32_1 = arith.constant 0 : i32
    return %c0_i32, %c0_i32_0 : i32, i32
  }
  func.func @transform_2(%arg0: i32, %arg1: i32) -> (i32, i32) {
    %c0_i32 = arith.constant 0 : i32
    %c0_i32_0 = arith.constant 0 : i32
    return %arg1, %c0_i32 : i32, i32
  }
  func.func @transform_3(%arg0: i32, %arg1: i32) -> (i32, i32, i32, i32) {
    %c0_i32 = arith.constant 0 : i32
    %c0_i32_0 = arith.constant 0 : i32
    %c0_i32_1 = arith.constant 0 : i32
    return %arg0, %arg1, %c0_i32, %c0_i32_0 : i32, i32, i32, i32
  }
  func.func @transform_4(%arg0: i32, %arg1: i32) -> (i32, i32, i32) {
    %c0_i32 = arith.constant 0 : i32
    %c0_i32_0 = arith.constant 0 : i32
    return %arg0, %arg1, %c0_i32 : i32, i32, i32
  }
}

</mosaic_0001>

<bundles_post_ra>
// kernel: tpu_custom_call.1
= control target key start
LH: loop header
LB: loop body
LE: loop exit
PB: predicated region body
PF: predicated region fallthrough
CT: control target
= control target key end

     0   :  { %s1350_s0 = inlined_call_operand.hbm [shape: f32[2,64,128], index: 0, kind: input, shape index: {}]   ;;  %s1351_s1 = inlined_call_operand.hbm [shape: f32[128,128], index: 1, kind: input, shape index: {}]   ;;  %s1352_s2 = inlined_call_operand.hbm [shape: f32[64,128], index: 2, kind: input, shape index: {}]   ;;  %s1353_s3 = inlined_call_operand.hbm [shape: f32[2,1,4,128], index: 3, kind: input, shape index: {}]   ;;  %s1354_s4 = inlined_call_operand.hbm [shape: f32[2,64,128], index: 4, kind: output, shape index: {}]  }
   0x1   :  { %1358 = sst [smem:[#allocation17_spill]] %s1350_s0 }
   0x2   :  { %1359 = sst [smem:[#allocation18_spill]] %s1351_s1 }
   0x3   :  { %1360 = sst [smem:[#allocation19_spill]] %s1352_s2 }
   0x4   :  { %9 = vsyncpa [#allocation3], 0 }
   0x5   :  { %11 = vsyncpa [#allocation3 + $0x1], 0 }
   0x6   :  { %12 = vsyncpa [#allocation6], 0 }
   0x7   :  { %13 = vsyncpa [#allocation9], 0 }
   0x8   :  { %15 = vsyncpa [#allocation9 + $0x1], 0 }
   0x9   :  { %16 = vsyncpa [#allocation4], 0 }
   0xa   :  { %18 = vsyncpa [#allocation4 + $0x1], 0  ;;  %s1112_s15 = smov 0   ;;  %s1114_s16 = smov 0  }
   0xb   :  { %s1116_s17 = smov 0   ;;  %s1118_s18 = smov 0  }
   0xc   :  { %s1120_s19 = smov 0   ;;  %s1122_s20 = smov 0  }
   0xd LB: > { %s661_s21 = sadd.s32 4294967295, %s1075_s20   ;;  %s662_s22 = sadd.s32 4294967294, %s1075_s20   ;;  %s1075_s20 = sphi %s1122_s20, %s24_s20   ;;  %s1071_s19 = sphi %s1120_s19, %s1384_s19   ;;  %s1067_s18 = sphi %s1118_s18, %s1383_s18   ;;  %s1063_s17 = sphi %s1116_s17, %s1382_s17   ;;  %s1059_s16 = sphi %s1114_s16, %s1381_s16   ;;  %s1055_s15 = sphi %s1112_s15, %s1380_s15  }
   0xe   : > { %s45_s23 = sadd.s32 1, %s1063_s17  ;;  %p52_p0 = scmp.ne.s32.totalorder %s1063_s17, %s1059_s16 }
   0xf   : > { %p53_p1 = scmp.eq.s32.totalorder %s1075_s20, 0  ;;  %p58_p2 = scmp.ne.s32.totalorder %s1059_s16, %s1055_s15 }
  0x10   : > { %p1150_p3 = scmp.eq.s32.totalorder %s661_s21, 0  ;;  %p159_p4 = scmp.eq.s32.totalorder %s661_s21, 1 }
  0x11   : > { %p1154_p5 = por %p53_p1, %p52_p0  ;;  %p165_p6 = scmp.eq.s32.totalorder %s662_s22, 1 }
  0x12   : > { %p1160_p7 = por %p1150_p3, %p58_p2  ;;  %p1164_p8 = por %p159_p4, %p52_p0 }
  0x13   : > { %p1168_p9 = por %p165_p6, %p58_p2  ;;  %p663_p10 = scmp.ge.s32.totalorder %s1075_s20, 1 }
  0x14   : > { %p172_p11 = scmp.lt.s32.totalorder %s1075_s20, 3  ;;  %s1077_s30 = smov [#allocation5]  }
  0x15   : > { %s1365_s28 = scalar_select %p1168_p9, 1, 0 }
  0x16   : > { %p1174_p12 = pnand %p663_p10, %p172_p11  ;;  %s184_s5 = sshll.u32 %s1077_s30, 4  ;;  %s185_s5 = int_to_ptr.vmem [resolvable:$true] %s184_s5 }
  0x17   : > { %s1078_s7 = smov [#allocation7]   ;;  %s36_s9 = sadd.s32 1, %s1071_s19 }
  0x18   : > { %p800_p13 = pneg %p1174_p12  ;;  %s200_s8 = sshll.u32 %s1078_s7, 4  ;;  %s201_s8 = int_to_ptr.vmem [resolvable:$true] %s200_s8 }
  0x19   : > { %s890_s10 = scalar_lea.vmem %s185_s5, 2048  ;;  %p898_p11 = scmp.lt.s32.totalorder %s185_s5, %s185_s5 }
  0x1a   : > { %p1183_p1 = pnand %p800_p13, %p1150_p3  ;;  %p891_p4 = scmp.ne.s32.totalorder %s185_s5, %s890_s10 }
  0x1b   : > { %p899_p0 = scmp.lt.s32.totalorder %s890_s10, %s890_s10 }
  0x1c   : > { %p881_p2 = pneg %p1183_p1 }
  0x1d   : > { %p900_p13 = por %p899_p0, %p898_p11 }
  0x1e   : > { %p893_p6 = pnand %p891_p4, %p881_p2 }
  0x20   : > { %p894_p10 = pneg %p893_p6 }
  0x22   : > { %p901_p9 = pnand %p900_p13, %p894_p10 }
  0x24   : > { %904 = shalt.err (!%p901_p9)
}
  0x25   : > { %s1355_s11 = smov 128   ;;  %s1356_s12 = smov 8  }
  0x26   : > { %s1368_s1 = sld [smem:[#allocation18_spill]]  ;;  %s916_s21 = scalar_lea.vmem %s201_s8, 1024 }
  0x27   : > { %p917_p4 = scmp.ne.s32.totalorder %s201_s8, %s916_s21  ;;  %p924_p10 = scmp.lt.s32.totalorder %s201_s8, %s201_s8 }
  0x28   : > { %p925_p9 = scmp.lt.s32.totalorder %s916_s21, %s916_s21 }
  0x29   : > { %p919_p6 = pnand %p917_p4, %p881_p2 }
  0x2a   : > { %p926_p11 = por %p925_p9, %p924_p10 }
  0x2b   : > { %p920_p0 = pneg %p919_p6 }
  0x2c   : > { %803 = dma.hbm_to_vmem [thread:$0]  (!%p1183_p1), %s1368_s1, 2048, %s185_s5, [#allocation6], %s1355_s11, %s1355_s11, %s1356_s12  }
  0x2d   : > { %p927_p13 = pnand %p926_p11, %p920_p0 }
  0x2f   : > { %930 = shalt.err (!%p927_p13)
}
  0x30   : > { %s1369_s2 = sld [smem:[#allocation19_spill]]  ;;  %p38_p2 = scmp.ge.s32.totalorder %s36_s9, 2 }
  0x31   : > { %p820_p4 = scmp.lt.s32.totalorder %s1075_s20, 2  ;;  %s1214_s5 = sand.u32 1, %s1063_s17  }
  0x32   : > { %s684_s6 = sshll.u32 %s1071_s19, 10  ;;  %s1386_s9 = smov (%p38_p2, %s36_s9), 0 }
  0x33   : > { %1370 = sst [smem:[#allocation15_spill]] %s1386_s9  ;;  %s667_s7 = sshll.u32 %s1214_s5, 6 }
  0x34   : > { %s40_s10 = ssub.s32 %s1071_s19, %s1386_s9  ;;  %s1371_s0 = sld [smem:[#allocation17_spill]] }
  0x35   : > { %p43_p6 = scmp.eq.s32.totalorder %s40_s10, 0  ;;  %s218_s22 = scalar_lea.vmem [#allocation2], %s667_s7 }
  0x36   : > { %806 = dma.hbm_to_vmem [thread:$0]  (!%p1183_p1), %s1369_s2, 1024, %s201_s8, [#allocation6], %s1355_s11, %s1355_s11, %s1356_s12  }
  0x37   : > { %s227_s30 = sshll.u32 %s218_s22, 4  ;;  %p1227_p1 = pnand %p820_p4, %p1154_p5  ;;  %s228_s30 = int_to_ptr.vmem [resolvable:$true] %s227_s30 }
  0x38   : > { %s1234_s11 = scalar_select %p43_p6, %s1063_s17, %s45_s23  }
  0x39   : > { %s215_s12 = scalar_lea.sflag [#allocation3], %s1214_s5  ;;  %p933_p0 = pneg %p1227_p1 }
  0x3a   : > { %s226_s21 = scalar_lea.hbm %s1371_s0, %s684_s6  ;;  %1373 = sst [smem:[#allocation16_spill]] %s1234_s11 }
  0x3b   : > { %s944_s10 = scalar_lea.vmem %s228_s30, 1024  ;;  %s1081_s25 = smov [#allocation2]  }
  0x3c   : > { %p945_p10 = scmp.ne.s32.totalorder %s228_s30, %s944_s10  ;;  %s949_s6 = sshll.u32 %s1081_s25, 4  ;;  %s950_s6 = int_to_ptr.vmem [resolvable:$false] %s949_s6 }
  0x3d   : > { %s951_s7 = scalar_lea.vmem %s950_s6, 2048  ;;  %p952_p5 = scmp.lt.s32.totalorder %s228_s30, %s950_s6 }
  0x3e   : > { %p947_p9 = pnand %p945_p10, %p933_p0  ;;  %p953_p13 = scmp.lt.s32.totalorder %s951_s7, %s944_s10 }
  0x40   : > { %p948_p11 = pneg %p947_p9  ;;  %p954_p2 = por %p953_p13, %p952_p5 }
  0x42   : > { %p955_p4 = pnand %p954_p2, %p948_p11 }
  0x44   : > { %958 = shalt.err (!%p955_p4)
}
  0x45   : > { %s1374_s23 = smov 8   ;;  %s1375_s13 = smov 128  }
  0x46   : > { %810 = dma.hbm_to_vmem [thread:$0]  (!%p1227_p1), %s226_s21, 1024, %s228_s30, %s215_s12, %s1375_s13, %s1375_s13, %s1374_s23  }
  0x47   : > { %s670_s14 = sshll.u32 %s1214_s5, 2  ;;  %s671_s22 = sshll.u32 %s1071_s19, 6 }
  0x48   : > { %s247_s6 = scalar_lea.hbm %s1353_s3, %s671_s22  ;;  %s241_s10 = scalar_lea.vmem [#allocation8], %s670_s14 }
  0x49   : > { %s249_s7 = sshll.u32 %s241_s10, 4  ;;  %s238_s1 = scalar_lea.sflag [#allocation9], %s1214_s5  ;;  %s250_s7 = int_to_ptr.vmem [resolvable:$true] %s249_s7 }
  0x4a   : > { %s972_s2 = scalar_lea.vmem %s250_s7, 64  ;;  %s1082_s9 = smov [#allocation8]  }
  0x4b   : > { %p973_p6 = scmp.ne.s32.totalorder %s250_s7, %s972_s2  ;;  %s977_s11 = sshll.u32 %s1082_s9, 4  ;;  %s978_s11 = int_to_ptr.vmem [resolvable:$false] %s977_s11 }
  0x4c   : > { %s979_s12 = scalar_lea.vmem %s978_s11, 128  ;;  %p980_p11 = scmp.lt.s32.totalorder %s250_s7, %s978_s11 }
  0x4d   : > { %p975_p10 = pnand %p973_p6, %p933_p0  ;;  %p981_p5 = scmp.lt.s32.totalorder %s979_s12, %s972_s2 }
  0x4f   : > { %p976_p9 = pneg %p975_p10  ;;  %p982_p13 = por %p981_p5, %p980_p11 }
  0x51   : > { %p983_p2 = pnand %p982_p13, %p976_p9 }
  0x53   : > { %986 = shalt.err (!%p983_p2)
}
  0x54   : > { %813 = dma.hbm_to_vmem [thread:$0]  (!%p1227_p1), %s247_s6, 64, %s250_s7, %s238_s1  }
  0x55   : > { %258 = sbr.rel (%p1174_p12) target bundleno = 347 (0x15b), region = 36  ;;  %s1261_s0 = sand.u32 (!%p1174_p12), 1, %s1059_s16  }
  0x56   : > { %s673_s9 = sshll.u32 (!%p1174_p12), %s1261_s0, 6  ;;  %s261_s5 = scalar_lea.sflag (!%p1174_p12), [#allocation3], %s1261_s0 }
  0x57   : > { %s1267_s2 = scalar_lea.vmem (!%p1174_p12), [#allocation2], %s673_s9 }
  0x5a   : > { %1038 = dma.done.wait (%p1160_p7), %s261_s5, 1024  }
  0x5b   : > { %1040 = vsyncadd (%p1160_p7), %s261_s5, 4294966272 }
  0x5c   : > { %1042 = dma.done.wait (%p1150_p3), [#allocation6], 3072  }
  0x5d   : > { %1044 = vsyncadd (%p1150_p3), [#allocation6], 4294964224  ;;  %s676_s1 = sshll.u32 %s1261_s0, 2  ;;  %s278_s29 = scalar_lea.sflag [#allocation9], %s1261_s0 }
  0x5e   : > { %s1279_s11 = scalar_lea.vmem [#allocation8], %s676_s1 }
  0x5f   : > { %1046 = dma.done.wait (%p1160_p7), %s278_s29, 64  }
  0x60   : > { %1048 = vsyncadd (%p1160_p7), %s278_s29, 4294967232  ;;  %v337_v0 = vld [vmem:[#allocation5 + $0x78] sm:$0xff]  ;;  %v336_v1 = vld [vmem:[#allocation5 + $0x70] sm:$0xff]  ;;  %v1083_v24 = vmov 1966171168   ;;  %v464_v26 = vlaneseq  ;;  %s310_s24 = scalar_lea.vmem [#allocation10], %s673_s9 }
  0x61   : > { %710 = vmatprep.subr.mxu0 %v337_v0  ;;  %754 = vmatprep.subr.mxu1 %v337_v0  ;;  %v335_v2 = vld [vmem:[#allocation5 + $0x68] sm:$0xff]  ;;  %v334_v3 = vld [vmem:[#allocation5 + $0x60] sm:$0xff]  ;;  %v333_v4 = vld [vmem:[#allocation5 + $0x58] sm:$0xff]  ;;  %v462_v25 = vunpack.c.l.s4 %v1083_v24  ;;  %s529_s26 = sshll.u32 %s310_s24, 4  ;;  %s685_s21 = sshll.u32 %s1067_s18, 10  ;;  %s1297_s26 = int_to_ptr.vmem [resolvable:$true] %s529_s26 }
  0x62   : > { %711 = vmatpush3.msra.mxu0 %v337_v0  ;;  %770 = vmatpush3.msra.mxu1 %v337_v0  ;;  %v332_v5 = vld [vmem:[#allocation5 + $0x50] sm:$0xff]  ;;  %v331_v6 = vld [vmem:[#allocation5 + $0x48] sm:$0xff]  ;;  %v330_v7 = vld [vmem:[#allocation5 + $0x40] sm:$0xff]  ;;  %v465_v28 = vshrl.u32 %v464_v26, 7  ;;  %s1302_s23 = scalar_lea.hbm %s1354_s4, %s685_s21  ;;  %s514_s18 = scalar_lea.sflag [#allocation4], %s1261_s0 }
  0x63   : > { %712 = vmatprep.subr.mxu0 %v336_v1  ;;  %755 = vmatprep.subr.mxu1 %v336_v1  ;;  %v329_v8 = vld [vmem:[#allocation5 + $0x38] sm:$0xff]  ;;  %v328_v9 = vld [vmem:[#allocation5 + $0x30] sm:$0xff]  ;;  %v327_v10 = vld [vmem:[#allocation5 + $0x28] sm:$0xff]  ;;  %v463_v27 = vunpack.c.0.s8 %v462_v25  ;;  %s987_s13 = scalar_lea.vmem %s1297_s26, 1024  ;;  %s1084_s14 = smov [#allocation10]  }
  0x64   : > { %713 = vmatpush3.msra.mxu0 %v336_v1  ;;  %771 = vmatpush3.msra.mxu1 %v336_v1  ;;  %v326_v11 = vld [vmem:[#allocation5 + $0x20] sm:$0xff]  ;;  %v325_v12 = vld [vmem:[#allocation5 + $0x18] sm:$0xff]  ;;  %v324_v13 = vld [vmem:[#allocation5 + $0x10] sm:$0xff]  ;;  %v479_v34 = vsub.s32 0, %v465_v28  ;;  %p988_p3 = scmp.ne.s32.totalorder %s1297_s26, %s987_s13  ;;  %s991_s22 = sshll.u32 %s1084_s14, 4  ;;  %s992_s22 = int_to_ptr.vmem [resolvable:$false] %s991_s22 }
  0x65   : > { %714 = vmatprep.subr.mxu0 %v335_v2  ;;  %756 = vmatprep.subr.mxu1 %v335_v2  ;;  %v323_v14 = vld [vmem:[#allocation5 + $0x8] sm:$0xff]  ;;  %v322_v15 = vld [vmem:[#allocation5] sm:$0xff]  ;;  %v316_v20 = vld [vmem:[%s1267_s2 + $0x10] sm:$0xff]  ;;  %v466_v29 = vsub.s32 %v463_v27, %v465_v28  ;;  %s993_s25 = scalar_lea.vmem %s992_s22, 2048  ;;  %p994_p1 = scmp.lt.s32.totalorder %s1297_s26, %s992_s22 }
  0x66   : > { %715 = vmatpush3.msra.mxu0 %v335_v2  ;;  %772 = vmatpush3.msra.mxu1 %v335_v2  ;;  %v314_v16 = vld [vmem:[%s1267_s2] sm:$0xff]  ;;  %v315_v18 = vld [vmem:[%s1267_s2 + $0x8] sm:$0xff]  ;;  %v320_v21 = vld [vmem:[%s1267_s2 + $0x30] sm:$0xff]  ;;  %p989_p7 = pnand %p988_p3, %p1164_p8  ;;  %p995_p0 = scmp.lt.s32.totalorder %s993_s25, %s987_s13 }
  0x67   : > { %716 = vmatprep.subr.mxu0 %v334_v3  ;;  %757 = vmatprep.subr.mxu1 %v334_v3  ;;  %v318_v17 = vld [vmem:[%s1267_s2 + $0x20] sm:$0xff]  ;;  %v319_v19 = vld [vmem:[%s1267_s2 + $0x28] sm:$0xff]  ;;  %v317_v22 = vld [vmem:[%s1267_s2 + $0x18] sm:$0xff] }
  0x68   : > { %717 = vmatpush3.msra.mxu0 %v334_v3  ;;  %773 = vmatpush3.msra.mxu1 %v334_v3  ;;  %v321_v23 = vld [vmem:[%s1267_s2 + $0x38] sm:$0xff]  ;;  %v678_v30 = vld.sshfl [vmem:[%s1279_s11] sm:$0x33 pattern:$0x75316420]  ;;  %v339_v36 = vld [vmem:[#allocation7 + $0x8] sm:$0xff]  ;;  %p990_p12 = pneg %p989_p7  ;;  %p996_p4 = por %p995_p0, %p994_p1 }
  0x69   : > { %718 = vmatprep.subr.mxu0 %v333_v4  ;;  %758 = vmatprep.subr.mxu1 %v333_v4  ;;  %v460_v31 = vcombine.high %v678_v30, %v678_v30  ;;  %v467_v32 = vrot.slane %v678_v30, %v466_v29  ;;  %v343_v37 = vld [vmem:[#allocation7 + $0x28] sm:$0xff]  ;;  %v338_v43 = vld [vmem:[#allocation7] sm:$0xff]  ;;  %v341_v49 = vld [vmem:[#allocation7 + $0x18] sm:$0xff] }
  0x6a   : > { %719 = vmatpush3.msra.mxu0 %v333_v4  ;;  %774 = vmatpush3.msra.mxu1 %v333_v4  ;;  %v342_v44 = vld [vmem:[#allocation7 + $0x20] sm:$0xff]  ;;  %v345_v51 = vld [vmem:[#allocation7 + $0x38] sm:$0xff]  ;;  %v340_v59 = vld [vmem:[#allocation7 + $0x10] sm:$0xff]  ;;  %p997_p6 = pnand %p996_p4, %p990_p12 }
  0x6b   : > { %720 = vmatprep.subr.mxu0 %v332_v5  ;;  %759 = vmatprep.subr.mxu1 %v332_v5  ;;  %v474_v33 = vrot.slane %v460_v31, %v466_v29  ;;  %v475_v35 = vcombine.high %v467_v32, %v467_v32  ;;  %v480_v39 = vrot.slane %v467_v32, %v479_v34  ;;  %v344_v60 = vld [vmem:[#allocation7 + $0x30] sm:$0xff] }
  0x6c   : > { %721 = vmatpush3.msra.mxu0 %v332_v5  ;;  %775 = vmatpush3.msra.mxu1 %v332_v5 }
  0x6d   : > { %722 = vmatprep.subr.mxu0 %v331_v6  ;;  %760 = vmatprep.subr.mxu1 %v331_v6  ;;  %v476_v38 = vcombine.high %v474_v33, %v474_v33  ;;  %v488_v40 = vrot.slane %v475_v35, %v479_v34  ;;  %v484_v50 = vrot.slane %v474_v33, %v479_v34 }
  0x6e   : > { %723 = vmatpush3.msra.mxu0 %v331_v6  ;;  %776 = vmatpush3.msra.mxu1 %v331_v6 }
  0x6f   : > { %724 = vmatprep.subr.mxu0 %v330_v7  ;;  %761 = vmatprep.subr.mxu1 %v330_v7  ;;  %v492_v52 = vrot.slane %v476_v38, %v479_v34 }
  0x70   : > { %725 = vmatpush3.msra.mxu0 %v330_v7  ;;  %777 = vmatpush3.msra.mxu1 %v330_v7 }
  0x71   : > { %726 = vmatprep.subr.mxu0 %v329_v8  ;;  %762 = vmatprep.subr.mxu1 %v329_v8 }
  0x72   : > { %727 = vmatpush3.msra.mxu0 %v329_v8  ;;  %778 = vmatpush3.msra.mxu1 %v329_v8 }
  0x73   : > { %728 = vmatprep.subr.mxu0 %v328_v9  ;;  %763 = vmatprep.subr.mxu1 %v328_v9 }
  0x74   : > { %729 = vmatpush3.msra.mxu0 %v328_v9  ;;  %779 = vmatpush3.msra.mxu1 %v328_v9 }
  0x75   : > { %730 = vmatprep.subr.mxu0 %v327_v10  ;;  %764 = vmatprep.subr.mxu1 %v327_v10 }
  0x76   : > { %731 = vmatpush3.msra.mxu0 %v327_v10  ;;  %780 = vmatpush3.msra.mxu1 %v327_v10 }
  0x77   : > { %732 = vmatprep.subr.mxu0 %v326_v11  ;;  %765 = vmatprep.subr.mxu1 %v326_v11 }
  0x78   : > { %733 = vmatpush3.msra.mxu0 %v326_v11  ;;  %781 = vmatpush3.msra.mxu1 %v326_v11 }
  0x79   : > { %734 = vmatprep.subr.mxu0 %v325_v12  ;;  %766 = vmatprep.subr.mxu1 %v325_v12 }
  0x7a   : > { %735 = vmatpush3.msra.mxu0 %v325_v12  ;;  %782 = vmatpush3.msra.mxu1 %v325_v12 }
  0x7b   : > { %736 = vmatprep.subr.mxu0 %v324_v13  ;;  %767 = vmatprep.subr.mxu1 %v324_v13 }
  0x7c   : > { %737 = vmatpush3.msra.mxu0 %v324_v13  ;;  %783 = vmatpush3.msra.mxu1 %v324_v13 }
  0x7d   : > { %738 = vmatprep.subr.mxu0 %v323_v14  ;;  %768 = vmatprep.subr.mxu1 %v323_v14 }
  0x7e   : > { %739 = vmatpush3.msra.mxu0 %v323_v14  ;;  %784 = vmatpush3.msra.mxu1 %v323_v14 }
  0x7f   : > { %740 = vmatprep.subr.mxu0 %v322_v15  ;;  %769 = vmatprep.subr.mxu1 %v322_v15 }
  0x80   : > { %741 = vmatpush3.msra.mxu0 %v322_v15  ;;  %785 = vmatpush3.msra.mxu1 %v322_v15 }
  0x81   : > { %742 = vmatprep.mubr.f32.mxu0 %v314_v16  ;;  %748 = vmatprep.mubr.f32.mxu1 %v318_v17 }
  0x82   : > { %743 = vmatmul.mubr.f32.vlgmr.msra.gmra.mxu0 %v315_v18  ;;  %749 = vmatmul.mubr.f32.vlgmr.msra.gmra.mxu1 %v319_v19 }
  0x83   : > { %745 = vmatprep.mubr.f32.mxu0 %v316_v20  ;;  %751 = vmatprep.mubr.f32.mxu1 %v320_v21 }
  0x86   : > { %746 = vmatmul.mubr.f32.gmra.mxu0 %v317_v22  ;;  %752 = vmatmul.mubr.f32.gmra.mxu1 %v321_v23 }
 0x142   : > { %v744_v41 = vpop.f32.mrf.mxu0  ;;  %v750_v42 = vpop.f32.mrf.mxu1 }
 0x143   : > { %v418_v45 = vadd.f32 %v744_v41, %v339_v36  ;;  %v438_v46 = vadd.f32 %v750_v42, %v343_v37 }
 0x144   : > { %v412_v47 = vpop.f32.mrf.mxu0  ;;  %v432_v48 = vpop.f32.mrf.mxu1 }
 0x145   : > { %v498_v53 = vadd.f32 %v480_v39, %v418_v45  ;;  %v502_v54 = vadd.f32 %v488_v40, %v438_v46  ;;  %v413_v55 = vadd.f32 %v412_v47, %v338_v43  ;;  %v433_v56 = vadd.f32 %v432_v48, %v342_v44 }
 0x146   : > { %v747_v57 = vpop.f32.mrf.mxu0  ;;  %v753_v58 = vpop.f32.mrf.mxu1 }
 0x147   : > { %506 = vst [vmem:[%s310_s24 + $0x8] sm:$0xff] %v498_v53  ;;  %510 = vst [vmem:[%s310_s24 + $0x28] sm:$0xff] %v502_v54  ;;  %v497_v61 = vadd.f32 %v480_v39, %v413_v55  ;;  %v501_v62 = vadd.f32 %v488_v40, %v433_v56  ;;  %v428_v63 = vadd.f32 %v747_v57, %v341_v49 }
 0x148   : > { %v448_v0 = vadd.f32 %v753_v58, %v345_v51  ;;  %v422_v1 = vpop.f32.mrf.mxu0  ;;  %v442_v2 = vpop.f32.mrf.mxu1 }
 0x149   : > { %505 = vst [vmem:[%s310_s24] sm:$0xff] %v497_v61  ;;  %509 = vst [vmem:[%s310_s24 + $0x20] sm:$0xff] %v501_v62  ;;  %v500_v3 = vadd.f32 %v484_v50, %v428_v63  ;;  %v423_v5 = vadd.f32 %v422_v1, %v340_v59  ;;  %v443_v6 = vadd.f32 %v442_v2, %v344_v60 }
 0x14a   : > { %v504_v4 = vadd.f32 %v492_v52, %v448_v0 }
 0x14b   : > { %508 = vst [vmem:[%s310_s24 + $0x18] sm:$0xff] %v500_v3  ;;  %v499_v7 = vadd.f32 %v484_v50, %v423_v5  ;;  %v503_v8 = vadd.f32 %v492_v52, %v443_v6 }
 0x14c   : > { %512 = vst [vmem:[%s310_s24 + $0x38] sm:$0xff] %v504_v4 }
 0x14d   : > { %507 = vst [vmem:[%s310_s24 + $0x10] sm:$0xff] %v499_v7  ;;  %511 = vst [vmem:[%s310_s24 + $0x30] sm:$0xff] %v503_v8 }
 0x14e   : > { %1000 = shalt.err (!%p997_p6)
}
 0x14f   : > { %s1001_s6 = scalar_lea.hbm %s1302_s23, 1024  ;;  %s1005_s12 = scalar_lea.hbm %s1354_s4, 2048 }
 0x150   : > { %p1002_p10 = scmp.ne.s32.totalorder %s1302_s23, %s1001_s6  ;;  %p1006_p5 = scmp.lt.s32.totalorder %s1302_s23, %s1354_s4 }
 0x151   : > { %p1007_p13 = scmp.lt.s32.totalorder %s1005_s12, %s1001_s6 }
 0x152   : > { %p1003_p9 = pnand %p1002_p10, %p1164_p8 }
 0x153   : > { %p1008_p2 = por %p1007_p13, %p1006_p5 }
 0x154   : > { %p1004_p11 = pneg %p1003_p9 }
 0x156   : > { %p1009_p3 = pnand %p1008_p2, %p1004_p11 }
 0x158   : > { %1012 = shalt.err (!%p1009_p3)
}
 0x159   : > { %s1085_s2 = smov 128   ;;  %s1086_s1 = smov 8  }
 0x15a   : > { %798 = dma.vmem_to_hbm [thread:$0]  (%p1164_p8), %s1297_s26, 1024, %s1302_s23, %s514_s18, %s1085_s2, %s1085_s2, %s1086_s1  }
 0x15b PF: > { %s544_s29 = sand.u32 1, %s1055_s15   ;;  %p1376_p7 = scmp.ne.s32.totalorder %s1365_s28, 0 }
 0x15c   : > { %p1377_p12 = scmp.ge.s32.totalorder %s1075_s20, 2  ;;  %s545_s11 = scalar_lea.sflag [#allocation4], %s544_s29 }
 0x15e   : > { %p815_p1 = pnand %p1377_p12, %p1376_p7 }
 0x160   : > { %p816_p0 = pneg %p815_p1 }
 0x162   : > { %1050 = dma.done.wait (%p816_p0), %s545_s11, 1024  }
 0x163   : > { %1052 = vsyncadd (%p816_p0), %s545_s11, 4294966272  ;;  %s24_s20 = sadd.s32 1, %s1075_s20   ;;  %s1378_s27 = sld [smem:[#allocation16_spill]] }
 0x164   : > { %p21_p4 = scmp.ge.s32.totalorder %s24_s20, 4   ;;  %s1379_s0 = sld [smem:[#allocation15_spill]] }
 0x165   : > { %s1380_s15 = smov %s1059_s16  ;;  %s1381_s16 = smov %s1063_s17 }
 0x166   : > { %s1383_s18 = smov %s1071_s19  ;;  %23 = sbr.rel (!%p21_p4) target bundleno = 13 (0xd), region = 103 }
 0x169   : > { %s1382_s17 = smov %s1378_s27 }
 0x16a   : > { %s1384_s19 = smov %s1379_s0 }
 0x16b   :  { %550 = vsyncpa [#allocation3], 1 }
 0x16c   :  { %552 = vsyncpa [#allocation3 + $0x1], 1 }
 0x16d   :  { %553 = vsyncpa [#allocation6], 1 }
 0x16e   :  { %554 = vsyncpa [#allocation9], 1 }
 0x16f   :  { %556 = vsyncpa [#allocation9 + $0x1], 1 }
 0x170   :  { %557 = vsyncpa [#allocation4], 1 }
 0x171   :  { %559 = vsyncpa [#allocation4 + $0x1], 1 }

</bundles_post_ra>
